<compile_context>
chip_gen: v6e
topology: v6e:2x2x1
jax: 0.10.0
libtpu: 0.0.40
codegen_flags: <defaults>
</compile_context>

<pallas_src>
import jax
import jax.numpy as jnp
from jax.experimental import pallas as pl
from jax.experimental.pallas import tpu as pltpu

_LANE = 128


def _round_up(x, m):
    return ((x + m - 1) // m) * m


def node2vec_mlp_kernel(s_ref, t_ref, w1s_ref, w1t_ref, b1_ref, w2_ref, b2_ref, o_ref):
    cdt = w1s_ref.dtype  # compute dtype: bf16 fast path / f32 exact path
    # hidden = relu([s, t] @ W1 + b1) == relu(s @ W1s + t @ W1t + b1); f32 accum.
    # Embeddings arrive in their stored dtype; downcast (if any) happens here,
    # in VMEM, instead of as a separate HBM round trip in the wrapper.
    h = jnp.dot(s_ref[...].astype(cdt), w1s_ref[...],
                preferred_element_type=jnp.float32)
    h = h + jnp.dot(t_ref[...].astype(cdt), w1t_ref[...],
                    preferred_element_type=jnp.float32)
    h = jnp.maximum(h + b1_ref[...], 0.0)                     # [tile, Hp] f32
    # fc2 on the VPU/XLU: broadcast the w2 row, multiply, reduce over lanes.
    out = jnp.sum(h * w2_ref[...], axis=-1, keepdims=True)    # [tile, 1] f32
    out = out + b2_ref[0]                                     # SMEM scalar
    o_ref[...] = out.astype(o_ref.dtype)


def node2vec_mlp_params(w1, b1, w2, b2, *, weight_dtype=jnp.bfloat16):
    """Prepare fc1/fc2 parameters ONCE (outside the per-call forward).

    w1: [2*D, H], b1: [H], w2: [H, 1], b2: [1]  -- weights in [in, out] layout
    (transposed from PyTorch's [out, in]).  The hidden dim is zero-padded to a
    multiple of 128 so all post-matmul work is lane-dense; padded w2 entries are
    zero so the math is unchanged.
    """
    two_d, H = w1.shape
    assert two_d % 2 == 0
    D = two_d // 2
    Hp = _round_up(H, _LANE)
    pad = ((0, 0), (0, Hp - H))
    w1s = jnp.pad(w1[:D, :], pad).astype(weight_dtype)          # [D, Hp]
    w1t = jnp.pad(w1[D:, :], pad).astype(weight_dtype)          # [D, Hp]
    b1p = jnp.pad(b1.reshape(1, H), pad).astype(jnp.float32)    # [1, Hp] f32
    w2p = jnp.pad(w2.reshape(1, H), pad).astype(jnp.float32)    # [1, Hp] f32
    b2p = b2.reshape(1).astype(jnp.float32)                     # [1]  (SMEM)
    return (w1s, w1t, b1p, w2p, b2p)


def _default_vmem_budget():
    """~3/4 of physical VMEM: ~48 MiB on v7x (64 MiB/TC), ~96 MiB on v5e/v6e."""
    cap = 64 * 1024 * 1024
    try:
        cap = int(pltpu.get_tpu_info().vmem_capacity_bytes)
    except Exception:
        pass
    return min(cap * 3 // 4, 96 * 1024 * 1024)


def _pick_batch_tile(B, D, Hp, emb_itemsize, w_itemsize, vmem_budget,
                     target_step_bytes=4 * 1024 * 1024):
    """Largest batch tile that fits the VMEM budget, capped once per-step input
    bytes reach ~target_step_bytes; guarantees >=2 grid steps whenever the batch
    allows (so the parallel grid axis can shard across v7x's 2 TensorCores)."""
    if B < 8:
        return B                                   # tiny batch: one full block
    B8 = _round_up(B, 8)
    # Tile-independent VMEM: W1 halves (assume double-buffered) + b1 + w2 row.
    fixed = 2 * (2 * D * Hp * w_itemsize) + 2 * (2 * Hp * 4)
    # Per-row VMEM: double-buffered s/t blocks, f32 hidden intermediate (x2
    # fudge for un-fused dot results), lane-padded [tile, 1] output blocks.
    per_row = (2 * 2 * D * emb_itemsize) + (2 * Hp * 4) + (2 * _LANE * 4)
    avail = max(vmem_budget - fixed, per_row * 8)
    max_tile = max(8, (avail // per_row) // 8 * 8)
    # Stop growing once per-step input traffic reaches the target.
    want = _round_up(max(8, target_step_bytes // max(1, 2 * D * emb_itemsize)), 8)
    tile = min(max_tile, want, B8)
    # Guarantee at least 2 grid steps when the batch allows (megacore sharding).
    if B8 >= 16 and pl.cdiv(B8, tile) < 2:
        tile = _round_up(pl.cdiv(B8, 2), 8)
    return int(tile)


def node2vec_mlp_forward(source_emb, target_emb, params, *,
                         batch_tile=None, vmem_budget=None):
    """source_emb / target_emb: [B, D]; params from node2vec_mlp_params()."""
    w1s, w1t, b1p, w2p, b2p = params
    B, D = source_emb.shape
    assert target_emb.shape == (B, D)
    assert w1s.shape[0] == D and w1t.shape[0] == D
    Hp = w1s.shape[1]
    out_dtype = source_emb.dtype

    # NOTE: if the production embedding dim D is < 128 the (tile, D) input
    # blocks are lane-sparse; prefer a lane-multiple D (or a source||target
    # contiguous HBM layout) upstream rather than padding at call time.
    emb_bytes = jnp.dtype(source_emb.dtype).itemsize
    w_bytes = jnp.dtype(w1s.dtype).itemsize
    if vmem_budget is None:
        vmem_budget = _default_vmem_budget()
    if batch_tile is None:
        batch_tile = _pick_batch_tile(B, D, Hp, emb_bytes, w_bytes, vmem_budget)
    num_tiles = pl.cdiv(B, batch_tile)

    cost = pl.CostEstimate(
        flops=int(2 * B * (2 * D) * Hp + 4 * B * Hp),
        transcendentals=0,
        bytes_accessed=int(2 * B * D * emb_bytes                  # s + t
                           + 2 * D * Hp * w_bytes                 # W1 halves
                           + 2 * Hp * 4 + 4                       # b1, w2 row, b2
                           + B * jnp.dtype(out_dtype).itemsize),  # output
    )

    return pl.pallas_call(
        node2vec_mlp_kernel,
        out_shape=jax.ShapeDtypeStruct((B, 1), out_dtype),
        grid_spec=pltpu.PrefetchScalarGridSpec(
            num_scalar_prefetch=0,
            grid=(num_tiles,),
            in_specs=[
                pl.BlockSpec((batch_tile, D), lambda i: (i, 0)),    # source tile
                pl.BlockSpec((batch_tile, D), lambda i: (i, 0)),    # target tile
                pl.BlockSpec((D, Hp), lambda i: (0, 0)),            # W1 source half
                pl.BlockSpec((D, Hp), lambda i: (0, 0)),            # W1 target half
                pl.BlockSpec((1, Hp), lambda i: (0, 0)),            # b1 (f32)
                pl.BlockSpec((1, Hp), lambda i: (0, 0)),            # w2 row (f32)
                pl.BlockSpec(memory_space=pltpu.MemorySpace.SMEM),  # b2 scalar
            ],
            out_specs=pl.BlockSpec((batch_tile, 1), lambda i: (i, 0)),
        ),
        compiler_params=pltpu.CompilerParams(
            dimension_semantics=("parallel",),     # batch tiles shard across TCs
            vmem_limit_bytes=int(vmem_budget),
        ),
        cost_estimate=cost,
    )(source_emb, target_emb, w1s, w1t, b1p, w2p, b2p)


def node2vec_mlp(source_emb, target_emb, w1, b1, w2, b2, *,
                 weight_dtype=jnp.bfloat16, batch_tile=None):
    """Convenience one-shot wrapper (prepares params on every call; prefer
    node2vec_mlp_params() + node2vec_mlp_forward() when weights are reused)."""
    params = node2vec_mlp_params(w1, b1, w2, b2, weight_dtype=weight_dtype)
    return node2vec_mlp_forward(source_emb, target_emb, params,
                                batch_tile=batch_tile)


def _torch_linear_init(key, fan_in, fan_out):
    """Deterministic init matching nn.Linear's U(-1/sqrt(fan_in), 1/sqrt(fan_in))."""
    kw, kb = jax.random.split(key)
    bound = 1.0 / jnp.sqrt(jnp.float32(fan_in))
    # weight stored as [in, out] (transposed vs PyTorch's [out, in])
    w = jax.random.uniform(kw, (fan_in, fan_out), jnp.float32, -bound, bound)
    b = jax.random.uniform(kb, (fan_out,), jnp.float32, -bound, bound)
    return w, b


def reference_forward(source_emb, target_emb, w1, b1, w2, b2):
    x = jnp.concatenate([source_emb, target_emb], axis=1)
    x = jnp.maximum(x @ w1 + b1, 0.0)
    return x @ w2 + b2


if __name__ == "__main__":
    B, D, H = 32, 16, 32   # batch, in_dim, hidden_dim (small demo shapes)

    key = jax.random.PRNGKey(0)
    k_s, k_t, k_fc1, k_fc2 = jax.random.split(key, 4)

    source_emb = jax.random.normal(k_s, (B, D), jnp.float32)
    target_emb = jax.random.normal(k_t, (B, D), jnp.float32)

    w1, b1 = _torch_linear_init(k_fc1, 2 * D, H)   # fc1: Linear(in_dim*2, hidden_dim)
    w2, b2 = _torch_linear_init(k_fc2, H, 1)       # fc2: Linear(hidden_dim, 1)

    ref = reference_forward(source_emb, target_emb, w1, b1, w2, b2)

    # f32-weight path (same math as the reference; tolerance covers the MXU's
    # default f32 matmul precision and the split-K + lane-reduce summation order).
    params_f32 = node2vec_mlp_params(w1, b1, w2, b2, weight_dtype=jnp.float32)
    out_f32 = jax.block_until_ready(
        node2vec_mlp_forward(source_emb, target_emb, params_f32))
    assert out_f32.shape == (B, 1)
    assert jnp.allclose(out_f32, ref, atol=1e-2, rtol=1e-2)

    # Default fast path: bf16 weights prepared ONCE, f32 embeddings streamed
    # as-is and downcast to bf16 inside the kernel, f32 accumulation.
    params_bf16 = node2vec_mlp_params(w1, b1, w2, b2, weight_dtype=jnp.bfloat16)
    fwd = jax.jit(node2vec_mlp_forward)
    out = jax.block_until_ready(fwd(source_emb, target_emb, params_bf16))
    assert out.shape == (B, 1)
    assert jnp.allclose(out, ref, atol=2e-2, rtol=2e-2)

    print("KERNEL_OK")
</pallas_src>

<mosaic_0001>
module attributes {stable_mosaic.version = 11 : i64} {
  func.func @node2vec_mlp_kernel(%arg0: i32, %arg1: memref<16x16xf32, #tpu.memory_space<vmem>>, %arg2: memref<16x16xf32, #tpu.memory_space<vmem>>, %arg3: memref<16x128xf32, #tpu.memory_space<vmem>>, %arg4: memref<16x128xf32, #tpu.memory_space<vmem>>, %arg5: memref<1x128xf32, #tpu.memory_space<vmem>>, %arg6: memref<1x128xf32, #tpu.memory_space<vmem>>, %arg7: memref<1xf32, #tpu.memory_space<smem>>, %arg8: memref<16x1xf32, #tpu.memory_space<vmem>>) attributes {dimension_semantics = [#tpu.dimension_semantics<parallel>], iteration_bounds = array<i64: 2>, scalar_prefetch = 0 : i64, scratch_operands = 0 : i64, tpu.core_type = #tpu.core_type<tc>, window_params = [{transform_indices = @transform_0, window_bounds = array<i64: 16, 16>}, {transform_indices = @transform_1, window_bounds = array<i64: 16, 16>}, {pipeline_mode = #tpu.pipeline_mode<synchronous>, transform_indices = @transform_2, window_bounds = array<i64: 16, 128>}, {pipeline_mode = #tpu.pipeline_mode<synchronous>, transform_indices = @transform_3, window_bounds = array<i64: 16, 128>}, {pipeline_mode = #tpu.pipeline_mode<synchronous>, transform_indices = @transform_4, window_bounds = array<i64: 1, 128>}, {pipeline_mode = #tpu.pipeline_mode<synchronous>, transform_indices = @transform_5, window_bounds = array<i64: 1, 128>}, {transform_indices = @transform_6, window_bounds = array<i64: 1>}, {transform_indices = @transform_7, window_bounds = array<i64: 16, 1>}]} {
    %c0 = arith.constant 0 : index
    %c0_0 = arith.constant 0 : index
    %0 = vector.load %arg1[%c0, %c0_0] : memref<16x16xf32, #tpu.memory_space<vmem>>, vector<16x16xf32>
    %c0_1 = arith.constant 0 : index
    %c0_2 = arith.constant 0 : index
    %1 = vector.load %arg3[%c0_1, %c0_2] : memref<16x128xf32, #tpu.memory_space<vmem>>, vector<16x128xf32>
    %cst = arith.constant dense<0.000000e+00> : vector<16x128xf32>
    %2 = tpu.matmul %0, %1, %cst {dimension_numbers = #tpu.dot_dimension_numbers<[1], [0], [0], [1], [0, 0, 1, 1], [], []>} : vector<16x16xf32>, vector<16x128xf32>, vector<16x128xf32> -> vector<16x128xf32>
    %c0_3 = arith.constant 0 : index
    %c0_4 = arith.constant 0 : index
    %3 = vector.load %arg2[%c0_3, %c0_4] : memref<16x16xf32, #tpu.memory_space<vmem>>, vector<16x16xf32>
    %c0_5 = arith.constant 0 : index
    %c0_6 = arith.constant 0 : index
    %4 = vector.load %arg4[%c0_5, %c0_6] : memref<16x128xf32, #tpu.memory_space<vmem>>, vector<16x128xf32>
    %cst_7 = arith.constant dense<0.000000e+00> : vector<16x128xf32>
    %5 = tpu.matmul %3, %4, %cst_7 {dimension_numbers = #tpu.dot_dimension_numbers<[1], [0], [0], [1], [0, 0, 1, 1], [], []>} : vector<16x16xf32>, vector<16x128xf32>, vector<16x128xf32> -> vector<16x128xf32>
    %6 = arith.addf %2, %5 : vector<16x128xf32>
    %c0_8 = arith.constant 0 : index
    %c0_9 = arith.constant 0 : index
    %7 = vector.load %arg5[%c0_8, %c0_9] : memref<1x128xf32, #tpu.memory_space<vmem>>, vector<1x128xf32>
    %8 = vector.broadcast %7 : vector<1x128xf32> to vector<16x128xf32>
    %9 = arith.addf %6, %8 : vector<16x128xf32>
    %cst_10 = arith.constant 0.000000e+00 : f32
    %10 = vector.broadcast %cst_10 : f32 to vector<16x128xf32>
    %11 = arith.maximumf %9, %10 : vector<16x128xf32>
    %c0_11 = arith.constant 0 : index
    %c0_12 = arith.constant 0 : index
    %12 = vector.load %arg6[%c0_11, %c0_12] : memref<1x128xf32, #tpu.memory_space<vmem>>, vector<1x128xf32>
    %13 = vector.broadcast %12 : vector<1x128xf32> to vector<16x128xf32>
    %14 = arith.mulf %11, %13 : vector<16x128xf32>
    %cst_13 = arith.constant dense<0.000000e+00> : vector<16xf32>
    %15 = vector.multi_reduction <add>, %14, %cst_13 [1] : vector<16x128xf32> to vector<16xf32>
    %16 = vector.shape_cast %15 : vector<16xf32> to vector<16x1xf32>
    %c0_14 = arith.constant 0 : index
    %17 = memref.load %arg7[%c0_14] : memref<1xf32, #tpu.memory_space<smem>>
    %18 = vector.broadcast %17 : f32 to vector<16x1xf32>
    %19 = arith.addf %16, %18 : vector<16x1xf32>
    %c0_15 = arith.constant 0 : index
    %c0_16 = arith.constant 0 : index
    %20 = vector.load %arg8[%c0_15, %c0_16] : memref<16x1xf32, #tpu.memory_space<vmem>>, vector<16x1xf32>
    tpu.vector_store %arg8[%c0_15, %c0_16], %19 {strides = array<i32>} : memref<16x1xf32, #tpu.memory_space<vmem>>, vector<16x1xf32>,
    return
  }
  func.func @transform_0(%arg0: i32) -> (i32, i32) {
    %c0_i32 = arith.constant 0 : i32
    %c0_i32_0 = arith.constant 0 : i32
    return %arg0, %c0_i32 : i32, i32
  }
  func.func @transform_1(%arg0: i32) -> (i32, i32) {
    %c0_i32 = arith.constant 0 : i32
    %c0_i32_0 = arith.constant 0 : i32
    return %arg0, %c0_i32 : i32, i32
  }
  func.func @transform_2(%arg0: i32) -> (i32, i32) {
    %c0_i32 = arith.constant 0 : i32
    %c0_i32_0 = arith.constant 0 : i32
    %c0_i32_1 = arith.constant 0 : i32
    return %c0_i32, %c0_i32_0 : i32, i32
  }
  func.func @transform_3(%arg0: i32) -> (i32, i32) {
    %c0_i32 = arith.constant 0 : i32
    %c0_i32_0 = arith.constant 0 : i32
    %c0_i32_1 = arith.constant 0 : i32
    return %c0_i32, %c0_i32_0 : i32, i32
  }
  func.func @transform_4(%arg0: i32) -> (i32, i32) {
    %c0_i32 = arith.constant 0 : i32
    %c0_i32_0 = arith.constant 0 : i32
    %c0_i32_1 = arith.constant 0 : i32
    return %c0_i32, %c0_i32_0 : i32, i32
  }
  func.func @transform_5(%arg0: i32) -> (i32, i32) {
    %c0_i32 = arith.constant 0 : i32
    %c0_i32_0 = arith.constant 0 : i32
    %c0_i32_1 = arith.constant 0 : i32
    return %c0_i32, %c0_i32_0 : i32, i32
  }
  func.func @transform_6(%arg0: i32) -> i32 {
    %c0_i32 = arith.constant 0 : i32
    %c0_i32_0 = arith.constant 0 : i32
    return %c0_i32 : i32
  }
  func.func @transform_7(%arg0: i32) -> (i32, i32) {
    %c0_i32 = arith.constant 0 : i32
    %c0_i32_0 = arith.constant 0 : i32
    return %arg0, %c0_i32 : i32, i32
  }
}

</mosaic_0001>

<bundles_post_ra>
// kernel: tpu_custom_call.1
= control target key start
LH: loop header
LB: loop body
LE: loop exit
PB: predicated region body
PF: predicated region fallthrough
CT: control target
= control target key end

     0   :  { %s675_s26 = smov 0   ;;  %s718_s0 = inlined_call_operand.vmem [shape: f32[32,16], index: 0, kind: input, shape index: {}]   ;;  %s719_s1 = inlined_call_operand.vmem [shape: f32[32,16], index: 1, kind: input, shape index: {}]   ;;  %s720_s2 = inlined_call_operand.vmem [shape: f32[16,128], index: 2, kind: input, shape index: {}]   ;;  %s721_s3 = inlined_call_operand.vmem [shape: f32[16,128], index: 3, kind: input, shape index: {}]   ;;  %s722_s4 = inlined_call_operand.vmem [shape: f32[1,128], index: 4, kind: input, shape index: {}]   ;;  %s723_s5 = inlined_call_operand.vmem [shape: f32[1,128], index: 5, kind: input, shape index: {}]   ;;  %s724_s6 = inlined_call_operand.<no memory space> [shape: f32[1], index: 6, kind: input, shape index: {}]   ;;  %s725_s7 = inlined_call_operand.vmem [shape: f32[32,1], index: 7, kind: output, shape index: {}]  }
   0x1   :  { %12 = sst [smem:[#allocation2]] %s724_s6 }
   0x2 LB: > { %s575_s27 = sadd.s32 4294967295, %s630_s26   ;;  %p579_p0 = scmp.ge.s32.totalorder %s630_s26, 1  ;;  %s630_s26 = sphi %s675_s26, %s18_s26  }
   0x3   : > { %p250_p1 = scmp.lt.s32.totalorder %s630_s26, 3 }
   0x5   : > { %p251_p2 = pnand %p579_p0, %p250_p1 }
   0x6   : > { %s580_s10 = sshll.u32 (!%p251_p2), %s575_s27, 1  ;;  %s500_s24 = sld [smem:[#allocation2]] (!%p251_p2) }
   0x7   : > { %254 = sbr.rel (%p251_p2) target bundleno = 367 (0x16f), region = 48  ;;  %p288_p3 = scmp.lt.s32.totalorder (!%p251_p2), %s580_s10, 3 }
   0xc   : > { %v312_v0 = vld [vmem:[%s721_s3 + $0x8] sm:$0xff]  ;;  %v311_v2 = vld [vmem:[%s721_s3] sm:$0xff]  ;;  %s727_s10 = smov (!%p288_p3, %s580_s10), 3  ;;  %vm313_vm0 = vcmask 130048   ;;  %v501_v22 = vstv %s500_s24  ;;  %vm504_vm1 = vcmask 7168  }
   0xd   : > { %v308_v1 = vld [vmem:[%s720_s2 + $0x8] sm:$0xff]  ;;  %602 = vmatprep.subr.mxu0 %v312_v0  ;;  %v307_v3 = vld [vmem:[%s720_s2] sm:$0xff]  ;;  %s695_s13 = sshll.u32 %s727_s10, 3 }
   0xe   : > { %609 = vmatprep.subr.mxu1 %v308_v1  ;;  %603 = vmatpush3.msra.mxu0 %v312_v0  ;;  %s297_s16 = scalar_lea.vmem %s719_s1, %s695_s13  ;;  %s291_s19 = scalar_lea.vmem %s718_s0, %s695_s13  ;;  %v590_v12 = vld [vmem:[%s722_s4] ss:$0 sm:$0xff] }
   0xf   : > { %610 = vmatpush3.msra.mxu1 %v308_v1  ;;  %604 = vmatprep.subr.mxu0 %v311_v2  ;;  %v309_v4 = vld [vmem:[%s297_s16] sm:$0xff]  ;;  %v310_v5 = vld [vmem:[%s297_s16 + $0x8] sm:$0xff]  ;;  %s303_s28 = scalar_lea.vmem %s725_s7, %s695_s13 }
  0x10   : > { %611 = vmatprep.subr.mxu1 %v307_v3  ;;  %605 = vmatpush3.msra.mxu0 %v311_v2  ;;  %v305_v6 = vld [vmem:[%s291_s19] sm:$0xff]  ;;  %v306_v7 = vld [vmem:[%s291_s19 + $0x8] sm:$0xff] }
  0x11   : > { %612 = vmatpush3.msra.mxu1 %v307_v3  ;;  %606 = vmatprep.mubr.msk.f32.mxu0 %vm313_vm0, %v309_v4  ;;  %v591_v18 = vld [vmem:[%s723_s5] ss:$0 sm:$0xff] }
  0x12   : > { %613 = vmatprep.mubr.msk.f32.mxu1 %vm313_vm0, %v305_v6  ;;  %607 = vmatmul.mubr.msk.f32.vlgmr.msra.gmra.mxu0 %vm313_vm0, %v310_v5 }
  0x13   : > { %614 = vmatmul.mubr.msk.f32.vlgmr.msra.gmra.mxu1 %vm313_vm0, %v306_v7 }
  0xd2   : > { %v608_v8 = vpop.f32.mrf.mxu0 }
  0xd3   : > { %v615_v9 = vpop.f32.mrf.mxu1 }
  0xd4   : > { %v473_v10 = vadd.f32 %v615_v9, %v608_v8  ;;  %v386_v11 = vpop.f32.mrf.mxu0 }
  0xd5   : > { %v467_v13 = vpop.f32.mrf.mxu1 }
  0xd6   : > { %v468_v14 = vadd.f32 %v467_v13, %v386_v11  ;;  %v484_v15 = vadd.f32 %v590_v12, %v473_v10 }
  0xd8   : > { %v483_v16 = vadd.f32 %v590_v12, %v468_v14  ;;  %v486_v19 = vmax.f32 %v484_v15, 0.0 }
  0xda   : > { %v485_v17 = vmax.f32 %v483_v16, 0.0  ;;  %v495_v21 = vmul.f32 %v591_v18, %v486_v19 }
  0xdc   : > { %v494_v20 = vmul.f32 %v591_v18, %v485_v17 }
  0xde   : > { %496 = vadd.xlane.f32.xlu0 %v494_v20 }
  0xe2   : > { %498 = vadd.xlane.f32.xlu0 %v495_v21 }
 0x167   : > { %v497_v23 = vpop.xlane.xlu0 %496 }
 0x168   : > { %v502_v24 = vadd.f32 %v501_v22, %v497_v23 }
 0x16a   : > { %505 = vst.msk [vmem:[%s303_s28] sm:$0xff] %vm504_vm1, %v502_v24 }
 0x16b   : > { %v499_v25 = vpop.xlane.xlu0 %498 }
 0x16c   : > { %v503_v26 = vadd.f32 %v501_v22, %v499_v25 }
 0x16e   : > { %506 = vst.msk [vmem:[%s303_s28 + $0x8] sm:$0xff] %vm504_vm1, %v503_v26 }
 0x16f PF: > { %s18_s26 = sadd.s32 1, %s630_s26  }
 0x170   : > { %p15_p4 = scmp.ge.s32.totalorder %s18_s26, 4  }
 0x172   :  { %17 = sbr.rel (!%p15_p4) target bundleno = 2 (0x2), region = 81 }

</bundles_post_ra>
